<compile_context>
chip_gen: v7x
topology: tpu7x:2x2x1
jax: 0.10.0
libtpu: 0.0.40
codegen_flags: <defaults>
</compile_context>

<pallas_src>
import math
import functools

import jax
import jax.numpy as jnp
from jax.experimental import pallas as pl
from jax.experimental.pallas import tpu as pltpu


# --------------------------------------------------------------------------- #
# Helpers                                                                     #
# --------------------------------------------------------------------------- #
def _pick_tile(n, target, mult=8):
    """Largest tile <= target that divides n and is a multiple of `mult`
    (falls back to multiples of 8, then the full dimension)."""
    if n <= target:
        return n
    mults = (mult,) if mult == 8 else (mult, 8)
    for m in mults:
        t = (target // m) * m
        while t >= m:
            if n % t == 0:
                return t
            t -= m
    return n


def _padded_bytes(shape, dtype):
    """VMEM footprint of one block including (sublane, lane) tile padding."""
    isz = jnp.dtype(dtype).itemsize
    sub = 8 * (4 // isz)                 # 8 for f32, 16 for bf16, 32 for int8
    dims = list(shape)
    dims[-1] = -(-dims[-1] // 128) * 128
    if len(dims) >= 2:
        dims[-2] = -(-dims[-2] // sub) * sub
    n = isz
    for d in dims:
        n *= d
    return n


def _vmem_limit(block_bytes, scratch_bytes=0):
    """Scoped-VMEM limit: double-buffered blocks + scratch + margin, capped
    below the physical VMEM of the current generation (128 MiB v5e/v6e,
    64 MiB v7x) with headroom for Mosaic internal scratch."""
    need = 2 * block_bytes + scratch_bytes + (2 << 20)
    try:
        phys = getattr(pltpu.get_tpu_info(), "vmem_capacity_bytes", 64 << 20)
    except Exception:
        phys = 64 << 20
    cap = int(phys * 0.85)
    return int(min(max(need, 16 << 20), cap))


# --------------------------------------------------------------------------- #
# Kernel 1/3: generic linear  y = x @ W + b  (tiled over rows and columns)    #
# --------------------------------------------------------------------------- #
def _linear_kernel(x_ref, w_ref, b_ref, o_ref, *, mm_dtype):
    acc = jnp.dot(x_ref[...].astype(mm_dtype), w_ref[...].astype(mm_dtype),
                  preferred_element_type=jnp.float32)
    o_ref[...] = (acc + b_ref[...].astype(jnp.float32)).astype(o_ref.dtype)


def _linear(x2d, w, b, *, mm_dtype, out_dtype=None, tm_target=256, tn_target=512):
    M, K = x2d.shape
    N = w.shape[1]
    out_dtype = out_dtype or x2d.dtype
    TM = _pick_tile(M, tm_target, 8)
    TN = _pick_tile(N, tn_target, 128)
    # Full-K contraction blocks: fine up to very large D.
    # TODO(synk): add a K grid axis + f32 accumulator scratch for extreme D.
    blocks = (_padded_bytes((TM, K), x2d.dtype)
              + _padded_bytes((K, TN), w.dtype)
              + _padded_bytes((1, TN), b.dtype)
              + _padded_bytes((TM, TN), out_dtype))
    kernel = functools.partial(_linear_kernel, mm_dtype=mm_dtype)
    return pl.pallas_call(
        kernel,
        out_shape=jax.ShapeDtypeStruct((M, N), out_dtype),
        grid_spec=pltpu.PrefetchScalarGridSpec(
            num_scalar_prefetch=0,
            grid=(M // TM, N // TN),
            in_specs=[
                pl.BlockSpec((TM, K), lambda i, j: (i, 0)),
                pl.BlockSpec((K, TN), lambda i, j: (0, j)),
                pl.BlockSpec((1, TN), lambda i, j: (0, j)),
            ],
            out_specs=pl.BlockSpec((TM, TN), lambda i, j: (i, j)),
        ),
        compiler_params=pltpu.CompilerParams(
            dimension_semantics=("parallel", "parallel"),
            vmem_limit_bytes=_vmem_limit(blocks),
        ),
    )(x2d, w, b)


# --------------------------------------------------------------------------- #
# Kernel 2: flash attention (online softmax), heads batched, per-head output  #
# --------------------------------------------------------------------------- #
def _mha_flash_kernel(q_ref, kt_ref, v_ref, o_ref, m_sc, l_sc, acc_sc, *, mm_dtype):
    ki = pl.program_id(2)

    @pl.when(ki == 0)
    def _():
        m_sc[...] = jnp.full_like(m_sc, -jnp.inf)
        l_sc[...] = jnp.zeros_like(l_sc)
        acc_sc[...] = jnp.zeros_like(acc_sc)

    q = q_ref[0].astype(mm_dtype)      # (H, TQ, hd)   Q pre-scaled by 1/sqrt(hd)
    kt = kt_ref[0].astype(mm_dtype)    # (H, hd, TK)   lane-dense along keys
    v = v_ref[0].astype(mm_dtype)      # (H, TK, hd)

    # Scores: contraction over hd (Q lane dim / K^T sublane dim) — no scale mul.
    s = jnp.einsum("hqd,hdk->hqk", q, kt,
                   preferred_element_type=jnp.float32)            # (H, TQ, TK)

    m_prev = m_sc[...]
    m_new = jnp.maximum(m_prev, jnp.max(s, axis=-1, keepdims=True))
    alpha = jnp.exp(m_prev - m_new)
    p = jnp.exp(s - m_new)                                         # (H, TQ, TK)
    l_sc[...] = alpha * l_sc[...] + jnp.sum(p, axis=-1, keepdims=True)
    acc_sc[...] = alpha * acc_sc[...] + jnp.einsum(
        "hqk,hkd->hqd", p.astype(mm_dtype), v,
        preferred_element_type=jnp.float32)                        # (H, TQ, hd)
    m_sc[...] = m_new

    @pl.when(ki == pl.num_programs(2) - 1)
    def _():
        l = l_sc[...]
        inv_l = pl.reciprocal(l, approx=True)        # EUP slot (otherwise idle)
        inv_l = inv_l * (2.0 - l * inv_l)            # one Newton step -> ~f32 exact
        o_ref[0] = (acc_sc[...] * inv_l).astype(o_ref.dtype)


def multi_head_attention(x, params, *, num_heads, matmul_dtype=None):
    """Pallas forward pass matching the PyTorch MultiHeadAttention module.

    matmul_dtype: optional dtype for MXU operands (e.g. jnp.bfloat16) — useful
    on all generations to recover bf16 MXU throughput for an f32 input; f32
    accumulation is kept throughout.
    """
    B, S, D = x.shape
    H = num_heads
    hd = D // H
    dtype = x.dtype
    mm_dtype = jnp.dtype(matmul_dtype) if matmul_dtype is not None else jnp.dtype(dtype)

    wqkv = params["wqkv"].astype(dtype)            # (D, 3D)  pre-transposed
    bqkv = params["bqkv"].astype(jnp.float32)      # (1, 3D)
    wo = params["wo"].astype(dtype)                # (D, D)   pre-transposed
    bo = params["bo"].astype(jnp.float32)          # (1, D)

    # Fold the softmax scale 1/sqrt(hd) into the Q projection columns.
    scale = 1.0 / math.sqrt(hd)
    col_scale = jnp.concatenate(
        [jnp.full((D,), scale, jnp.float32), jnp.ones((2 * D,), jnp.float32)])
    wqkv = (wqkv.astype(jnp.float32) * col_scale[None, :]).astype(dtype)
    bqkv = bqkv * col_scale[None, :]

    # ---- Kernel 1: fused QKV projection (weight-streaming, column-tiled) ---- #
    qkv = _linear(x.reshape(B * S, D), wqkv, bqkv, mm_dtype=mm_dtype)  # (B*S, 3D)
    q, k, v = jnp.split(qkv, 3, axis=-1)

    # Wrapper-side layout plumbing (XLA): per-head layout; K pre-transposed so
    # its block is lane-dense along the key axis (no per-step vxpose in-kernel).
    q = q.reshape(B, S, H, hd).transpose(0, 2, 1, 3)     # (B, H, S, hd)
    kt = k.reshape(B, S, H, hd).transpose(0, 2, 3, 1)    # (B, H, hd, S)
    v = v.reshape(B, S, H, hd).transpose(0, 2, 1, 3)     # (B, H, S, hd)
    # TODO(synk): emit head-major q/kt/v directly from kernel 1 to save the
    # relayout HBM passes on mem-bound v5e.

    # Larger tiles than 128: halves/quarters K/V HBM re-read traffic and fills
    # the 256-wide MXUs on v6e/v7x.  _pick_tile falls back to S for small S.
    TQ = _pick_tile(S, 256, 8)
    TK = _pick_tile(S, 256, 128)

    blocks = (_padded_bytes((1, H, TQ, hd), dtype)       # q block
              + _padded_bytes((1, H, hd, TK), dtype)     # k^T block
              + _padded_bytes((1, H, TK, hd), dtype)     # v block
              + _padded_bytes((1, H, TQ, hd), dtype))    # output block
    scratch = (2 * _padded_bytes((H, TQ, 1), jnp.float32)
               + _padded_bytes((H, TQ, hd), jnp.float32))

    kernel = functools.partial(_mha_flash_kernel, mm_dtype=mm_dtype)
    attn = pl.pallas_call(
        kernel,
        out_shape=jax.ShapeDtypeStruct((B, H, S, hd), dtype),
        grid_spec=pltpu.PrefetchScalarGridSpec(
            num_scalar_prefetch=0,
            grid=(B, S // TQ, S // TK),
            in_specs=[
                pl.BlockSpec((1, H, TQ, hd), lambda b, qi, ki: (b, 0, qi, 0)),
                pl.BlockSpec((1, H, hd, TK), lambda b, qi, ki: (b, 0, 0, ki)),
                pl.BlockSpec((1, H, TK, hd), lambda b, qi, ki: (b, 0, ki, 0)),
            ],
            out_specs=pl.BlockSpec((1, H, TQ, hd), lambda b, qi, ki: (b, 0, qi, 0)),
            scratch_shapes=[
                pltpu.VMEM((H, TQ, 1), jnp.float32),     # running max
                pltpu.VMEM((H, TQ, 1), jnp.float32),     # running sum
                pltpu.VMEM((H, TQ, hd), jnp.float32),    # running PV accumulator
            ],
        ),
        compiler_params=pltpu.CompilerParams(
            dimension_semantics=("parallel", "parallel", "arbitrary"),
            vmem_limit_bytes=_vmem_limit(blocks, scratch),
        ),
    )(q, kt, v)

    # ---- Kernel 3: output projection as one full-depth (K = D) matmul ------- #
    # concat(heads): (B, H, S, hd) -> (B*S, D) relayout done by XLA; the
    # projection then runs with full MXU fill and Wo never sits in the
    # attention kernel's VMEM (v7x budget).
    attn2d = attn.transpose(0, 2, 1, 3).reshape(B * S, D)
    out = _linear(attn2d, wo, bo, mm_dtype=mm_dtype)
    return out.reshape(B, S, D)


# --------------------------------------------------------------------------- #
# Parameters / reference                                                      #
# --------------------------------------------------------------------------- #
def init_params(key, d_model, num_heads):
    # nn.Linear(in, out): weight (out, in), bias (out,).  Stored pre-transposed
    # (in, out) so the kernel computes x @ W + b.  Q/K/V weights fused into one
    # (d_model, 3*d_model) matrix.
    ks = jax.random.split(key, 8)

    def linear(kw, kb, fan_in, fan_out):
        bound = 1.0 / math.sqrt(fan_in)
        w = jax.random.uniform(kw, (fan_in, fan_out), jnp.float32, -bound, bound)
        b = jax.random.uniform(kb, (1, fan_out), jnp.float32, -bound, bound)
        return w, b

    wq, bq = linear(ks[0], ks[1], d_model, d_model)
    wk, bk = linear(ks[2], ks[3], d_model, d_model)
    wv, bv = linear(ks[4], ks[5], d_model, d_model)
    wo, bo = linear(ks[6], ks[7], d_model, d_model)
    return dict(
        wqkv=jnp.concatenate([wq, wk, wv], axis=1),
        bqkv=jnp.concatenate([bq, bk, bv], axis=1),
        wo=wo, bo=bo,
    )


def reference_mha(x, p, num_heads):
    # Pure-JAX reference mirroring the PyTorch forward.
    B, S, D = x.shape
    hd = D // num_heads
    wq, wk, wv = jnp.split(p["wqkv"], 3, axis=1)
    bq, bk, bv = jnp.split(p["bqkv"], 3, axis=1)
    q = x @ wq + bq
    k = x @ wk + bk
    v = x @ wv + bv

    def heads(t):
        return t.reshape(B, S, num_heads, hd).transpose(0, 2, 1, 3)

    q, k, v = heads(q), heads(k), heads(v)
    s = jnp.einsum("bhqd,bhkd->bhqk", q, k) / math.sqrt(hd)
    a = jax.nn.softmax(s, axis=-1)
    o = jnp.einsum("bhqk,bhkd->bhqd", a, v).transpose(0, 2, 1, 3).reshape(B, S, D)
    return o @ p["wo"] + p["bo"]


if __name__ == "__main__":
    B, S, D, H = 2, 8, 32, 4

    key = jax.random.PRNGKey(0)
    kx, kp = jax.random.split(key)
    x = jax.random.normal(kx, (B, S, D), jnp.float32)
    params = init_params(kp, D, H)
    ref = reference_mha(x, params, H)

    # f32 path (tight numerical check against the reference).
    out = jax.block_until_ready(multi_head_attention(x, params, num_heads=H))
    assert out.shape == (B, S, D)
    assert jnp.allclose(out, ref, atol=1e-4, rtol=1e-4), (
        float(jnp.max(jnp.abs(out - ref))))

    # f32 inputs with bf16 MXU operands (f32 accumulation inside).
    out_mx = jax.block_until_ready(
        multi_head_attention(x, params, num_heads=H, matmul_dtype=jnp.bfloat16))
    assert jnp.allclose(out_mx, ref, atol=5e-2, rtol=5e-2), (
        float(jnp.max(jnp.abs(out_mx - ref))))

    # bf16 path: halves HBM traffic / VMEM footprint, f32 accumulation inside.
    out_bf16 = jax.block_until_ready(
        multi_head_attention(x.astype(jnp.bfloat16), params, num_heads=H))
    assert jnp.allclose(out_bf16.astype(jnp.float32), ref, atol=5e-2, rtol=5e-2), (
        float(jnp.max(jnp.abs(out_bf16.astype(jnp.float32) - ref))))

    print("KERNEL_OK")
</pallas_src>

<mosaic_0001>
module attributes {stable_mosaic.version = 11 : i64} {
  func.func @_linear_kernel(%arg0: i32, %arg1: i32, %arg2: memref<16x32xf32, #tpu.memory_space<vmem>>, %arg3: memref<32x96xf32, #tpu.memory_space<vmem>>, %arg4: memref<1x96xf32, #tpu.memory_space<vmem>>, %arg5: memref<16x96xf32, #tpu.memory_space<vmem>>) attributes {dimension_semantics = [#tpu.dimension_semantics<parallel>, #tpu.dimension_semantics<parallel>], iteration_bounds = array<i64: 1, 1>, scalar_prefetch = 0 : i64, scratch_operands = 0 : i64, tpu.core_type = #tpu.core_type<tc>, window_params = [{transform_indices = @transform_0, window_bounds = array<i64: 16, 32>}, {transform_indices = @transform_1, window_bounds = array<i64: 32, 96>}, {transform_indices = @transform_2, window_bounds = array<i64: 1, 96>}, {transform_indices = @transform_3, window_bounds = array<i64: 16, 96>}]} {
    %c0 = arith.constant 0 : index
    %c0_0 = arith.constant 0 : index
    %0 = vector.load %arg2[%c0, %c0_0] : memref<16x32xf32, #tpu.memory_space<vmem>>, vector<16x32xf32>
    %c0_1 = arith.constant 0 : index
    %c0_2 = arith.constant 0 : index
    %1 = vector.load %arg3[%c0_1, %c0_2] : memref<32x96xf32, #tpu.memory_space<vmem>>, vector<32x96xf32>
    %cst = arith.constant dense<0.000000e+00> : vector<16x96xf32>
    %2 = tpu.matmul %0, %1, %cst {dimension_numbers = #tpu.dot_dimension_numbers<[1], [0], [0], [1], [0, 0, 1, 1], [], []>} : vector<16x32xf32>, vector<32x96xf32>, vector<16x96xf32> -> vector<16x96xf32>
    %c0_3 = arith.constant 0 : index
    %c0_4 = arith.constant 0 : index
    %3 = vector.load %arg4[%c0_3, %c0_4] : memref<1x96xf32, #tpu.memory_space<vmem>>, vector<1x96xf32>
    %4 = vector.broadcast %3 : vector<1x96xf32> to vector<16x96xf32>
    %5 = arith.addf %2, %4 : vector<16x96xf32>
    %c0_5 = arith.constant 0 : index
    %c0_6 = arith.constant 0 : index
    %6 = vector.load %arg5[%c0_5, %c0_6] : memref<16x96xf32, #tpu.memory_space<vmem>>, vector<16x96xf32>
    tpu.vector_store %arg5[%c0_5, %c0_6], %5 {strides = array<i32>} : memref<16x96xf32, #tpu.memory_space<vmem>>, vector<16x96xf32>,
    return
  }
  func.func @transform_0(%arg0: i32, %arg1: i32) -> (i32, i32) {
    %c0_i32 = arith.constant 0 : i32
    %c0_i32_0 = arith.constant 0 : i32
    return %arg0, %c0_i32 : i32, i32
  }
  func.func @transform_1(%arg0: i32, %arg1: i32) -> (i32, i32) {
    %c0_i32 = arith.constant 0 : i32
    %c0_i32_0 = arith.constant 0 : i32
    return %c0_i32, %arg1 : i32, i32
  }
  func.func @transform_2(%arg0: i32, %arg1: i32) -> (i32, i32) {
    %c0_i32 = arith.constant 0 : i32
    %c0_i32_0 = arith.constant 0 : i32
    return %c0_i32, %arg1 : i32, i32
  }
  func.func @transform_3(%arg0: i32, %arg1: i32) -> (i32, i32) {
    %c0_i32 = arith.constant 0 : i32
    return %arg0, %arg1 : i32, i32
  }
}

</mosaic_0001>

<bundles_post_ra>
// kernel: tpu_custom_call.1
= control target key start
LH: loop header
LB: loop body
LE: loop exit
PB: predicated region body
PF: predicated region fallthrough
CT: control target
= control target key end

     0   :  { %8 = vsyncpa [#allocation3], 0  ;;  %s337_s0 = inlined_call_operand.hbm [shape: f32[16,32], index: 0, kind: input, shape index: {}]   ;;  %s338_s1 = inlined_call_operand.hbm [shape: f32[32,96], index: 1, kind: input, shape index: {}]   ;;  %s339_s2 = inlined_call_operand.vmem [shape: f32[1,96], index: 2, kind: input, shape index: {}]   ;;  %s340_s3 = inlined_call_operand.hbm [shape: f32[16,96], index: 3, kind: output, shape index: {}]  }
   0x1   :  { %9 = vsyncpa [#allocation6], 0 }
   0x2   :  { %10 = vsyncpa [#allocation4], 0  ;;  %s264_s12 = smov [#allocation2]   ;;  %s192_s16 = scalar_lea.hbm %s337_s0, 256 }
   0x3   :  { %s16_s13 = sshll.u32 %s264_s12, 4  ;;  %p193_p0 = scmp.ne.s32.totalorder %s337_s0, %s192_s16  ;;  %s17_s13 = int_to_ptr.vmem [resolvable:$true] %s16_s13 }
   0x4   :  { %p196_p1 = scmp.lt.u32.totalorder %s192_s16, %s337_s0 }
   0x6   :  { %p198_p2 = pnand %p196_p1, %p193_p0 }
   0x8   :  { %201 = shalt.err (!%p198_p2)
}
   0x9   :  { %s202_s21 = scalar_lea.vmem %s17_s13, 256  ;;  %p207_p4 = scmp.lt.s32.totalorder %s17_s13, %s17_s13 }
   0xa   :  { %p203_p3 = scmp.ne.s32.totalorder %s17_s13, %s202_s21  ;;  %p208_p5 = scmp.lt.s32.totalorder %s202_s21, %s202_s21 }
   0xc   :  { %p209_p6 = por %p208_p5, %p207_p4 }
   0xe   :  { %p210_p7 = pnand %p209_p6, %p203_p3 }
  0x10   :  { %213 = shalt.err (!%p210_p7)
}
  0x11   :  { %s265_s22 = smov 128   ;;  %s266_s23 = smov 8  }
  0x12   :  { %22 = dma.hbm_to_vmem [thread:$0]  %s337_s0, 256, %s17_s13, [#allocation3], %s265_s22, %s265_s22, %s266_s23  }
  0x13   :  { %s267_s26 = smov [#allocation5]   ;;  %s214_s30 = scalar_lea.hbm %s338_s1, 512 }
  0x14   :  { %s28_s27 = sshll.u32 %s267_s26, 4  ;;  %p215_p8 = scmp.ne.s32.totalorder %s338_s1, %s214_s30  ;;  %s29_s27 = int_to_ptr.vmem [resolvable:$true] %s28_s27 }
  0x15   :  { %p218_p9 = scmp.lt.u32.totalorder %s214_s30, %s338_s1 }
  0x17   :  { %p220_p10 = pnand %p218_p9, %p215_p8 }
  0x19   :  { %223 = shalt.err (!%p220_p10)
}
  0x1a   :  { %s224_s8 = scalar_lea.vmem %s29_s27, 512  ;;  %p229_p12 = scmp.lt.s32.totalorder %s29_s27, %s29_s27 }
  0x1b   :  { %p225_p11 = scmp.ne.s32.totalorder %s29_s27, %s224_s8  ;;  %p230_p13 = scmp.lt.s32.totalorder %s224_s8, %s224_s8 }
  0x1d   :  { %p231_p0 = por %p230_p13, %p229_p12 }
  0x1f   :  { %p232_p1 = pnand %p231_p0, %p225_p11 }
  0x21   :  { %235 = shalt.err (!%p232_p1)
}
  0x22   :  { %34 = dma.hbm_to_vmem [thread:$0]  %s338_s1, 512, %s29_s27, [#allocation6], %s265_s22, %s265_s22, %s266_s23  }
  0x23   :  { %258 = dma.done.wait [#allocation3], 256  }
  0x24   :  { %259 = vsyncadd [#allocation3], 4294967040 }
  0x25   :  { %260 = dma.done.wait [#allocation6], 512  }
  0x26   :  { %261 = vsyncadd [#allocation6], 4294966784  ;;  %vm56_vm0 = vcmask 261120   ;;  %v45_v0 = vld [vmem:[#allocation5] sm:$0xff]  ;;  %v46_v1 = vld [vmem:[#allocation5 + $0x8] sm:$0xff]  ;;  %s268_s11 = smov [#allocation7]  }
  0x27   :  { %v47_v2 = vld [vmem:[#allocation5 + $0x10] sm:$0xff]  ;;  %v179_v3 = vpack.c.bf16 %v46_v1, %v45_v0  ;;  %v48_v4 = vld [vmem:[#allocation5 + $0x18] sm:$0xff]  ;;  %s146_s12 = sshll.u32 %s268_s11, 4  ;;  %vm138_vm1 = vcmask 785408   ;;  %s147_s12 = int_to_ptr.vmem [resolvable:$true] %s146_s12 }
  0x28   :  { %v43_v5 = vld [vmem:[#allocation2] sm:$0xff]  ;;  %v183_v6 = vpack.c.bf16 %v48_v4, %v47_v2  ;;  %v44_v7 = vld [vmem:[#allocation2 + $0x8] sm:$0xff]  ;;  %s236_s13 = scalar_lea.vmem %s147_s12, 256  ;;  %p241_p3 = scmp.lt.s32.totalorder %s147_s12, %s147_s12 }
  0x29   :  { %176 = vmatprep.mubr.msk.f32.mxu0 %vm56_vm0, %v43_v5  ;;  %180 = vmatprep.subr.bf16.mxu0 %v179_v3  ;;  %v159_v8 = vld [vmem:[%s339_s2] ss:$0 sm:$0xff]  ;;  %p237_p2 = scmp.ne.s32.totalorder %s147_s12, %s236_s13  ;;  %p242_p4 = scmp.lt.s32.totalorder %s236_s13, %s236_s13 }
  0x2a   :  { %182 = vmatpush3.bf16.msra.mxu0 %v179_v3 }
  0x2b   :  { %184 = vmatprep.subr.bf16.mxu0 %v183_v6  ;;  %p243_p5 = por %p242_p4, %p241_p3 }
  0x2d   :  { %p244_p6 = pnand %p243_p5, %p237_p2 }
  0x2e   :  { %186 = vmatpush3.bf16.msra.mxu0 %v183_v6 }
  0x31   :  { %177 = vmatmul.mubr.msk.f32.vlgmr.msra.gmra.mrb[0].mxu0 %vm56_vm0, %v44_v7 }
 0x104   :  { %v178_v9 = vpop.f32.mrb[0].mxu0 }
 0x105   :  { %v135_v10 = vadd.f32 %v178_v9, %v159_v8  ;;  %v129_v11 = vpop.f32.mrb[1].mxu0 }
 0x106   :  { %v130_v12 = vadd.f32 %v159_v8, %v129_v11 }
 0x107   :  { %140 = vst.msk [vmem:[#allocation7 + $0x8] sm:$0xff] %vm138_vm1, %v135_v10 }
 0x108   :  { %139 = vst.msk [vmem:[#allocation7] sm:$0xff] %vm138_vm1, %v130_v12 }
 0x109   :  { %247 = shalt.err (!%p244_p6)
}
 0x10a   :  { %s248_s2 = scalar_lea.hbm %s340_s3, 256 }
 0x10b   :  { %p249_p7 = scmp.ne.s32.totalorder %s340_s3, %s248_s2  ;;  %p252_p8 = scmp.lt.u32.totalorder %s248_s2, %s340_s3 }
 0x10d   :  { %p254_p9 = pnand %p252_p8, %p249_p7 }
 0x10f   :  { %257 = shalt.err (!%p254_p9)
}
 0x110   :  { %152 = dma.vmem_to_hbm [thread:$0]  %s147_s12, 256, %s340_s3, [#allocation4], %s265_s22, %s265_s22, %s266_s23  }
 0x111   :  { %262 = dma.done.wait [#allocation4], 256  }
 0x112   :  { %263 = vsyncadd [#allocation4], 4294967040 }
 0x113   :  { %156 = vsyncpa [#allocation3], 1 }
 0x114   :  { %157 = vsyncpa [#allocation6], 1 }
 0x115   :  { %158 = vsyncpa [#allocation4], 1 }

</bundles_post_ra>
